<compile_context>
chip_gen: v7x
topology: tpu7x:2x2x1
jax: 0.10.0
libtpu: 0.0.40
codegen_flags: <defaults>
</compile_context>

<pallas_src>
import functools
import math

import jax
import jax.numpy as jnp
from jax.experimental import pallas as pl
from jax.experimental.pallas import tpu as pltpu


_PAIRS = ((0, 0), (0, 1), (0, 2), (0, 3),
          (1, 1), (1, 2), (1, 3),
          (2, 2), (2, 3),
          (3, 3))


def _round_up(n, m):
    return ((n + m - 1) // m) * m


def _broken_model_kernel(chunk, xT_ref, bq_ref, cq_ref, wl_ref, o_ref):
    # xT_ref : (D=4, rows_per_tile, 128) VMEM -- batch dense on (sublane, lane)
    # bq_ref : (1, 10) SMEM -- upper-tri quad-form coeffs of B        (m2 = x^T B x)
    # cq_ref : (1, 10) SMEM -- upper-tri quad-form coeffs of C=15B+Q  (15*m2 + quad breaking)
    # wl_ref : (1, 4)  SMEM -- folded linear breaking weights (c1 @ spurions @ B)
    # o_ref  : (rows_per_tile, 128) VMEM -- lane/sublane-dense output
    rows = xT_ref.shape[1]
    n_chunks = rows // chunk

    # Hoist the 24 scalar coefficients out of the row-chunk loop.
    bq = [bq_ref[0, k] for k in range(10)]
    cq = [cq_ref[0, k] for k in range(10)]
    wl = [wl_ref[0, i] for i in range(4)]

    @pl.loop(0, n_chunks)
    def _(c):
        r0 = pl.multiple_of(c * chunk, chunk)
        x = [xT_ref[i, pl.ds(r0, chunk), :] for i in range(4)]   # 4 x (chunk, 128)

        m2 = None   # x^T B x
        rq = None   # x^T (15B + Q) x
        for k, (i, j) in enumerate(_PAIRS):
            p = x[i] * x[j]
            m2 = bq[k] * p if m2 is None else m2 + bq[k] * p
            rq = cq[k] * p if rq is None else rq + cq[k] * p

        lin = wl[0] * x[0]
        for i in range(1, 4):
            lin = lin + wl[i] * x[i]

        o_ref[pl.ds(r0, chunk), :] = m2 * m2 + rq + lin


def broken_model_forward(x, bi_tensor, spurions, coeffs1, coeffs2, *, target_rows=2048):
    """x: (N, 4) f32, bi_tensor: (4, 4) f32, spurions: (S, 4) f32,
    coeffs1/coeffs2: (S,) f32.  Returns (N,) f32 matching broken_model.forward."""
    N, D = x.shape
    assert D == 4, "broken_model is defined for 4-vectors"
    S = spurions.shape[0]

    x = x.astype(jnp.float32)
    B = bi_tensor.astype(jnp.float32)
    sp = spurions.astype(jnp.float32)
    c1 = coeffs1.reshape(S).astype(jnp.float32)
    c2 = coeffs2.reshape(S).astype(jnp.float32)

    # ---- grid-invariant algebraic fold (tiny, plain XLA) -------------------
    sB = sp @ B                                     # (S, 4)
    w_lin = (c1 @ sB).reshape(1, D)                 # (1, 4): sum_k c1_k * bs_k = w_lin . x
    Q = sB.T @ (c2[:, None] * sB)                   # (4, 4): sum_k c2_k * bs_k^2 = x^T Q x
    C = 15.0 * B + Q                                # combined quadratic form

    def quad_coeffs(M):
        # exact upper-triangular coefficients of x^T M x (no symmetry assumption)
        return jnp.stack([M[i, i] if i == j else M[i, j] + M[j, i]
                          for (i, j) in _PAIRS]).reshape(1, len(_PAIRS))

    bq = quad_coeffs(B)      # (1, 10)
    cq = quad_coeffs(C)      # (1, 10)

    # ---- batch layout: dense (D, n_rows, 128), pad only to a 128 multiple --
    n_rows = -(-N // 128)
    N_pad = n_rows * 128
    # TODO(synk): if the producer can supply x already as (D, n_rows, 128),
    # this transpose+pad (one extra HBM pass over x) can be removed entirely.
    xT = jnp.pad(x.T, ((0, 0), (0, N_pad - N))).reshape(D, n_rows, 128)

    # ---- tile sizing: MiB-scale blocks, >= 2 grid steps when possible ------
    if n_rows <= 8:
        rpt = n_rows                                  # full (tiny) array dim
    else:
        rpt = min(target_rows, _round_up(-(-n_rows // 2), 8))
    grid = -(-n_rows // rpt)                          # ragged last block allowed
    if rpt <= 256:
        chunk = rpt
    else:
        chunk = 256 if rpt % 256 == 0 else math.gcd(rpt, 256)

    out = pl.pallas_call(
        functools.partial(_broken_model_kernel, chunk),
        out_shape=jax.ShapeDtypeStruct((n_rows, 128), jnp.float32),
        grid=(grid,),
        in_specs=[
            pl.BlockSpec((D, rpt, 128), lambda i: (0, i, 0)),          # x tile
            pl.BlockSpec(memory_space=pltpu.MemorySpace.SMEM),         # bq
            pl.BlockSpec(memory_space=pltpu.MemorySpace.SMEM),         # cq
            pl.BlockSpec(memory_space=pltpu.MemorySpace.SMEM),         # w_lin
        ],
        out_specs=pl.BlockSpec((rpt, 128), lambda i: (i, 0)),
        compiler_params=pltpu.CompilerParams(
            dimension_semantics=("parallel",),
            vmem_limit_bytes=32 * 1024 * 1024),
    )(xT, bq, cq, w_lin)

    return out.reshape(N_pad)[:N]


def reference_forward(x, bi_tensor, spurions, coeffs1, coeffs2):
    S = spurions.shape[0]
    c1 = coeffs1.reshape(1, S)
    c2 = coeffs2.reshape(1, S)
    m2 = jnp.einsum('ni,ij,nj->n', x, bi_tensor, x)
    bs = jnp.einsum('si,ij,nj->ns', spurions, bi_tensor, x)
    out = m2 ** 2 + 15.0 * m2
    out = out + jnp.sum(c1 * bs + c2 * bs ** 2, axis=-1)
    return out


if __name__ == "__main__":
    key = jax.random.PRNGKey(0)
    k_b, k_x, k_sp = jax.random.split(key, 3)

    dinput = 4
    N = 1300         # exercises 128-padding, >1 grid step, and a ragged last block
    n_spur = 3       # number of spurions (module default is 1 zero spurion)

    # Parameter init matching __init__ with init='rand':
    #   bi_tensor = randn(d, d); bi_tensor = 0.5 * (bi_tensor + bi_tensor.T)
    bi = jax.random.normal(k_b, (dinput, dinput), dtype=jnp.float32)
    bi = 0.5 * (bi + bi.T)

    # Module default spurion is all-zeros; use nonzero ones so the
    # symmetry-breaking terms are exercised.
    spurions = jax.random.normal(k_sp, (n_spur, dinput), dtype=jnp.float32)

    coeffs = jnp.array([20.9983, -23.2444, 3.0459, 12.7176, -17.4378,
                        1.4378, 10.1877, 15.889, -11.5178, -4.3926],
                       dtype=jnp.float32)
    coeffs_2 = jnp.array([-0.8431, 5.7529, 19.0048, 3.2927, -14.946,
                          5.6997, -5.9202, -10.5052, 2.6883, 16.5809],
                         dtype=jnp.float32)
    # torch loop indexes coefficients with i % len(coeffs):
    idx = jnp.arange(n_spur) % coeffs.shape[0]
    c1 = coeffs[idx]
    c2 = coeffs_2[idx]

    x = jax.random.normal(k_x, (N, dinput), dtype=jnp.float32)

    out = broken_model_forward(x, bi, spurions, c1, c2)
    out = jax.block_until_ready(out)

    ref = reference_forward(x, bi, spurions, c1, c2)
    assert out.shape == (N,)
    assert jnp.allclose(out, ref, rtol=1e-4, atol=1e-3), "mismatch vs reference"

    print("KERNEL_OK")
</pallas_src>

<mosaic_0001>
module attributes {stable_mosaic.version = 11 : i64} {
  func.func @_broken_model_kernel(%arg0: i32, %arg1: memref<4x8x128xf32, #tpu.memory_space<vmem>>, %arg2: memref<1x10xf32, #tpu.memory_space<smem>>, %arg3: memref<1x10xf32, #tpu.memory_space<smem>>, %arg4: memref<1x4xf32, #tpu.memory_space<smem>>, %arg5: memref<8x128xf32, #tpu.memory_space<vmem>>) attributes {dimension_semantics = [#tpu.dimension_semantics<parallel>], iteration_bounds = array<i64: 2>, scalar_prefetch = 0 : i64, scratch_operands = 0 : i64, tpu.core_type = #tpu.core_type<tc>, window_params = [{transform_indices = @transform_0, window_bounds = array<i64: 4, 8, 128>}, {transform_indices = @transform_1, window_bounds = array<i64: 1, 10>}, {transform_indices = @transform_2, window_bounds = array<i64: 1, 10>}, {transform_indices = @transform_3, window_bounds = array<i64: 1, 4>}, {transform_indices = @transform_4, window_bounds = array<i64: 8, 128>}]} {
    %c0 = arith.constant 0 : index
    %c0_0 = arith.constant 0 : index
    %0 = memref.load %arg2[%c0, %c0_0] : memref<1x10xf32, #tpu.memory_space<smem>>
    %c0_1 = arith.constant 0 : index
    %c1 = arith.constant 1 : index
    %1 = memref.load %arg2[%c0_1, %c1] : memref<1x10xf32, #tpu.memory_space<smem>>
    %c0_2 = arith.constant 0 : index
    %c2 = arith.constant 2 : index
    %2 = memref.load %arg2[%c0_2, %c2] : memref<1x10xf32, #tpu.memory_space<smem>>
    %c0_3 = arith.constant 0 : index
    %c3 = arith.constant 3 : index
    %3 = memref.load %arg2[%c0_3, %c3] : memref<1x10xf32, #tpu.memory_space<smem>>
    %c0_4 = arith.constant 0 : index
    %c4 = arith.constant 4 : index
    %4 = memref.load %arg2[%c0_4, %c4] : memref<1x10xf32, #tpu.memory_space<smem>>
    %c0_5 = arith.constant 0 : index
    %c5 = arith.constant 5 : index
    %5 = memref.load %arg2[%c0_5, %c5] : memref<1x10xf32, #tpu.memory_space<smem>>
    %c0_6 = arith.constant 0 : index
    %c6 = arith.constant 6 : index
    %6 = memref.load %arg2[%c0_6, %c6] : memref<1x10xf32, #tpu.memory_space<smem>>
    %c0_7 = arith.constant 0 : index
    %c7 = arith.constant 7 : index
    %7 = memref.load %arg2[%c0_7, %c7] : memref<1x10xf32, #tpu.memory_space<smem>>
    %c0_8 = arith.constant 0 : index
    %c8 = arith.constant 8 : index
    %8 = memref.load %arg2[%c0_8, %c8] : memref<1x10xf32, #tpu.memory_space<smem>>
    %c0_9 = arith.constant 0 : index
    %c9 = arith.constant 9 : index
    %9 = memref.load %arg2[%c0_9, %c9] : memref<1x10xf32, #tpu.memory_space<smem>>
    %c0_10 = arith.constant 0 : index
    %c0_11 = arith.constant 0 : index
    %10 = memref.load %arg3[%c0_10, %c0_11] : memref<1x10xf32, #tpu.memory_space<smem>>
    %c0_12 = arith.constant 0 : index
    %c1_13 = arith.constant 1 : index
    %11 = memref.load %arg3[%c0_12, %c1_13] : memref<1x10xf32, #tpu.memory_space<smem>>
    %c0_14 = arith.constant 0 : index
    %c2_15 = arith.constant 2 : index
    %12 = memref.load %arg3[%c0_14, %c2_15] : memref<1x10xf32, #tpu.memory_space<smem>>
    %c0_16 = arith.constant 0 : index
    %c3_17 = arith.constant 3 : index
    %13 = memref.load %arg3[%c0_16, %c3_17] : memref<1x10xf32, #tpu.memory_space<smem>>
    %c0_18 = arith.constant 0 : index
    %c4_19 = arith.constant 4 : index
    %14 = memref.load %arg3[%c0_18, %c4_19] : memref<1x10xf32, #tpu.memory_space<smem>>
    %c0_20 = arith.constant 0 : index
    %c5_21 = arith.constant 5 : index
    %15 = memref.load %arg3[%c0_20, %c5_21] : memref<1x10xf32, #tpu.memory_space<smem>>
    %c0_22 = arith.constant 0 : index
    %c6_23 = arith.constant 6 : index
    %16 = memref.load %arg3[%c0_22, %c6_23] : memref<1x10xf32, #tpu.memory_space<smem>>
    %c0_24 = arith.constant 0 : index
    %c7_25 = arith.constant 7 : index
    %17 = memref.load %arg3[%c0_24, %c7_25] : memref<1x10xf32, #tpu.memory_space<smem>>
    %c0_26 = arith.constant 0 : index
    %c8_27 = arith.constant 8 : index
    %18 = memref.load %arg3[%c0_26, %c8_27] : memref<1x10xf32, #tpu.memory_space<smem>>
    %c0_28 = arith.constant 0 : index
    %c9_29 = arith.constant 9 : index
    %19 = memref.load %arg3[%c0_28, %c9_29] : memref<1x10xf32, #tpu.memory_space<smem>>
    %c0_30 = arith.constant 0 : index
    %c0_31 = arith.constant 0 : index
    %20 = memref.load %arg4[%c0_30, %c0_31] : memref<1x4xf32, #tpu.memory_space<smem>>
    %c0_32 = arith.constant 0 : index
    %c1_33 = arith.constant 1 : index
    %21 = memref.load %arg4[%c0_32, %c1_33] : memref<1x4xf32, #tpu.memory_space<smem>>
    %c0_34 = arith.constant 0 : index
    %c2_35 = arith.constant 2 : index
    %22 = memref.load %arg4[%c0_34, %c2_35] : memref<1x4xf32, #tpu.memory_space<smem>>
    %c0_36 = arith.constant 0 : index
    %c3_37 = arith.constant 3 : index
    %23 = memref.load %arg4[%c0_36, %c3_37] : memref<1x4xf32, #tpu.memory_space<smem>>
    %c0_i32 = arith.constant 0 : i32
    %c1_i32 = arith.constant 1 : i32
    %24 = arith.muli %c0_i32, %c1_i32 : i32
    %c0_i32_38 = arith.constant 0 : i32
    %25 = arith.addi %c0_i32_38, %24 : i32
    %c8_i32 = arith.constant 8 : i32
    %26 = arith.muli %25, %c8_i32 : i32
    %27 = tpu.assume_multiple %26, 8 : i32
    %c0_39 = arith.constant 0 : index
    %28 = arith.index_cast %27 : i32 to index
    %c0_40 = arith.constant 0 : index
    %29 = vector.load %arg1[%c0_39, %28, %c0_40] : memref<4x8x128xf32, #tpu.memory_space<vmem>>, vector<1x8x128xf32>
    %30 = vector.shape_cast %29 : vector<1x8x128xf32> to vector<8x128xf32>
    %c1_41 = arith.constant 1 : index
    %31 = arith.index_cast %27 : i32 to index
    %c0_42 = arith.constant 0 : index
    %32 = vector.load %arg1[%c1_41, %31, %c0_42] : memref<4x8x128xf32, #tpu.memory_space<vmem>>, vector<1x8x128xf32>
    %33 = vector.shape_cast %32 : vector<1x8x128xf32> to vector<8x128xf32>
    %c2_43 = arith.constant 2 : index
    %34 = arith.index_cast %27 : i32 to index
    %c0_44 = arith.constant 0 : index
    %35 = vector.load %arg1[%c2_43, %34, %c0_44] : memref<4x8x128xf32, #tpu.memory_space<vmem>>, vector<1x8x128xf32>
    %36 = vector.shape_cast %35 : vector<1x8x128xf32> to vector<8x128xf32>
    %c3_45 = arith.constant 3 : index
    %37 = arith.index_cast %27 : i32 to index
    %c0_46 = arith.constant 0 : index
    %38 = vector.load %arg1[%c3_45, %37, %c0_46] : memref<4x8x128xf32, #tpu.memory_space<vmem>>, vector<1x8x128xf32>
    %39 = vector.shape_cast %38 : vector<1x8x128xf32> to vector<8x128xf32>
    %40 = arith.mulf %30, %30 : vector<8x128xf32>
    %41 = vector.broadcast %0 : f32 to vector<8x128xf32>
    %42 = arith.mulf %41, %40 : vector<8x128xf32>
    %43 = vector.broadcast %10 : f32 to vector<8x128xf32>
    %44 = arith.mulf %43, %40 : vector<8x128xf32>
    %45 = arith.mulf %30, %33 : vector<8x128xf32>
    %46 = vector.broadcast %1 : f32 to vector<8x128xf32>
    %47 = arith.mulf %46, %45 : vector<8x128xf32>
    %48 = arith.addf %42, %47 : vector<8x128xf32>
    %49 = vector.broadcast %11 : f32 to vector<8x128xf32>
    %50 = arith.mulf %49, %45 : vector<8x128xf32>
    %51 = arith.addf %44, %50 : vector<8x128xf32>
    %52 = arith.mulf %30, %36 : vector<8x128xf32>
    %53 = vector.broadcast %2 : f32 to vector<8x128xf32>
    %54 = arith.mulf %53, %52 : vector<8x128xf32>
    %55 = arith.addf %48, %54 : vector<8x128xf32>
    %56 = vector.broadcast %12 : f32 to vector<8x128xf32>
    %57 = arith.mulf %56, %52 : vector<8x128xf32>
    %58 = arith.addf %51, %57 : vector<8x128xf32>
    %59 = arith.mulf %30, %39 : vector<8x128xf32>
    %60 = vector.broadcast %3 : f32 to vector<8x128xf32>
    %61 = arith.mulf %60, %59 : vector<8x128xf32>
    %62 = arith.addf %55, %61 : vector<8x128xf32>
    %63 = vector.broadcast %13 : f32 to vector<8x128xf32>
    %64 = arith.mulf %63, %59 : vector<8x128xf32>
    %65 = arith.addf %58, %64 : vector<8x128xf32>
    %66 = arith.mulf %33, %33 : vector<8x128xf32>
    %67 = vector.broadcast %4 : f32 to vector<8x128xf32>
    %68 = arith.mulf %67, %66 : vector<8x128xf32>
    %69 = arith.addf %62, %68 : vector<8x128xf32>
    %70 = vector.broadcast %14 : f32 to vector<8x128xf32>
    %71 = arith.mulf %70, %66 : vector<8x128xf32>
    %72 = arith.addf %65, %71 : vector<8x128xf32>
    %73 = arith.mulf %33, %36 : vector<8x128xf32>
    %74 = vector.broadcast %5 : f32 to vector<8x128xf32>
    %75 = arith.mulf %74, %73 : vector<8x128xf32>
    %76 = arith.addf %69, %75 : vector<8x128xf32>
    %77 = vector.broadcast %15 : f32 to vector<8x128xf32>
    %78 = arith.mulf %77, %73 : vector<8x128xf32>
    %79 = arith.addf %72, %78 : vector<8x128xf32>
    %80 = arith.mulf %33, %39 : vector<8x128xf32>
    %81 = vector.broadcast %6 : f32 to vector<8x128xf32>
    %82 = arith.mulf %81, %80 : vector<8x128xf32>
    %83 = arith.addf %76, %82 : vector<8x128xf32>
    %84 = vector.broadcast %16 : f32 to vector<8x128xf32>
    %85 = arith.mulf %84, %80 : vector<8x128xf32>
    %86 = arith.addf %79, %85 : vector<8x128xf32>
    %87 = arith.mulf %36, %36 : vector<8x128xf32>
    %88 = vector.broadcast %7 : f32 to vector<8x128xf32>
    %89 = arith.mulf %88, %87 : vector<8x128xf32>
    %90 = arith.addf %83, %89 : vector<8x128xf32>
    %91 = vector.broadcast %17 : f32 to vector<8x128xf32>
    %92 = arith.mulf %91, %87 : vector<8x128xf32>
    %93 = arith.addf %86, %92 : vector<8x128xf32>
    %94 = arith.mulf %36, %39 : vector<8x128xf32>
    %95 = vector.broadcast %8 : f32 to vector<8x128xf32>
    %96 = arith.mulf %95, %94 : vector<8x128xf32>
    %97 = arith.addf %90, %96 : vector<8x128xf32>
    %98 = vector.broadcast %18 : f32 to vector<8x128xf32>
    %99 = arith.mulf %98, %94 : vector<8x128xf32>
    %100 = arith.addf %93, %99 : vector<8x128xf32>
    %101 = arith.mulf %39, %39 : vector<8x128xf32>
    %102 = vector.broadcast %9 : f32 to vector<8x128xf32>
    %103 = arith.mulf %102, %101 : vector<8x128xf32>
    %104 = arith.addf %97, %103 : vector<8x128xf32>
    %105 = vector.broadcast %19 : f32 to vector<8x128xf32>
    %106 = arith.mulf %105, %101 : vector<8x128xf32>
    %107 = arith.addf %100, %106 : vector<8x128xf32>
    %108 = vector.broadcast %20 : f32 to vector<8x128xf32>
    %109 = arith.mulf %108, %30 : vector<8x128xf32>
    %110 = vector.broadcast %21 : f32 to vector<8x128xf32>
    %111 = arith.mulf %110, %33 : vector<8x128xf32>
    %112 = arith.addf %109, %111 : vector<8x128xf32>
    %113 = vector.broadcast %22 : f32 to vector<8x128xf32>
    %114 = arith.mulf %113, %36 : vector<8x128xf32>
    %115 = arith.addf %112, %114 : vector<8x128xf32>
    %116 = vector.broadcast %23 : f32 to vector<8x128xf32>
    %117 = arith.mulf %116, %39 : vector<8x128xf32>
    %118 = arith.addf %115, %117 : vector<8x128xf32>
    %119 = arith.mulf %104, %104 : vector<8x128xf32>
    %120 = arith.addf %119, %107 : vector<8x128xf32>
    %121 = arith.addf %120, %118 : vector<8x128xf32>
    %122 = arith.index_cast %27 : i32 to index
    %c0_47 = arith.constant 0 : index
    %123 = vector.load %arg5[%122, %c0_47] : memref<8x128xf32, #tpu.memory_space<vmem>>, vector<8x128xf32>
    tpu.vector_store %arg5[%122, %c0_47], %121 {strides = array<i32>} : memref<8x128xf32, #tpu.memory_space<vmem>>, vector<8x128xf32>,
    %c1_i32_48 = arith.constant 1 : i32
    return
  }
  func.func @transform_0(%arg0: i32) -> (i32, i32, i32) {
    %c0_i32 = arith.constant 0 : i32
    %c0_i32_0 = arith.constant 0 : i32
    %c0_i32_1 = arith.constant 0 : i32
    return %c0_i32, %arg0, %c0_i32_0 : i32, i32, i32
  }
  func.func @transform_1(%arg0: i32) -> (i32, i32) {
    %c0_i32 = arith.constant 0 : i32
    %c0_i32_0 = arith.constant 0 : i32
    %c0_i32_1 = arith.constant 0 : i32
    return %c0_i32, %c0_i32_0 : i32, i32
  }
  func.func @transform_2(%arg0: i32) -> (i32, i32) {
    %c0_i32 = arith.constant 0 : i32
    %c0_i32_0 = arith.constant 0 : i32
    %c0_i32_1 = arith.constant 0 : i32
    return %c0_i32, %c0_i32_0 : i32, i32
  }
  func.func @transform_3(%arg0: i32) -> (i32, i32) {
    %c0_i32 = arith.constant 0 : i32
    %c0_i32_0 = arith.constant 0 : i32
    %c0_i32_1 = arith.constant 0 : i32
    return %c0_i32, %c0_i32_0 : i32, i32
  }
  func.func @transform_4(%arg0: i32) -> (i32, i32) {
    %c0_i32 = arith.constant 0 : i32
    %c0_i32_0 = arith.constant 0 : i32
    return %arg0, %c0_i32 : i32, i32
  }
}

</mosaic_0001>

<bundles_post_ra>
// kernel: tpu_custom_call.1
= control target key start
LH: loop header
LB: loop body
LE: loop exit
PB: predicated region body
PF: predicated region fallthrough
CT: control target
= control target key end

     0   :  { %s1036_s0 = inlined_call_operand.vmem [shape: f32[4,11,128], index: 0, kind: input, shape index: {}]   ;;  %s1037_s1 = inlined_call_operand.vmem [shape: f32[1,10], index: 1, kind: input, shape index: {}]   ;;  %s1038_s2 = inlined_call_operand.vmem [shape: f32[1,10], index: 2, kind: input, shape index: {}]   ;;  %s1039_s3 = inlined_call_operand.vmem [shape: f32[1,4], index: 3, kind: input, shape index: {}]   ;;  %s1040_s4 = inlined_call_operand.hbm [shape: f32[11,128], index: 4, kind: output, shape index: {}]  }
   0x1   :  { %1044 = sst [smem:[#allocation13_spill]] %s1036_s0 }
   0x2   :  { %9 = vsyncpa [#allocation5], 0 }
   0x3   :  { %10 = vsyncpa [#allocation7], 0 }
   0x4   :  { %11 = vsyncpa [#allocation4], 0 }
   0x5   :  { %13 = vsyncpa [#allocation4 + $0x1], 0  ;;  %s769_s15 = smov 0   ;;  %s771_s16 = smov 0  }
   0x6   :  { %s773_s17 = smov 0   ;;  %s775_s18 = smov 0  }
   0x7 LB: > { %s790_s19 = sadd.s32 4294967295, %s738_s18   ;;  %s511_s20 = sadd.s32 4294967294, %s738_s18   ;;  %s738_s18 = sphi %s775_s18, %s1062_s18   ;;  %s734_s17 = sphi %s773_s17, %s1061_s17   ;;  %s730_s16 = sphi %s771_s16, %s1060_s16   ;;  %s726_s15 = sphi %s769_s15, %s1059_s15  }
   0x8   : > { %s794_s21 = sadd.s32 1, %s738_s18   ;;  %s26_s22 = sadd.s32 1, %s734_s17 }
   0x9   : > { %s23_s23 = ssub.s32 %s738_s18, %s794_s21  ;;  %p33_p0 = scmp.ne.s32.totalorder %s734_s17, %s730_s16 }
   0xa   : > { %p24_p1 = scmp.eq.s32.totalorder %s23_s23, 0  ;;  %p34_p2 = scmp.eq.s32.totalorder %s738_s18, 0 }
   0xb   : > { %p126_p3 = scmp.eq.s32.totalorder %s790_s19, 1  ;;  %p131_p4 = scmp.ne.s32.totalorder %s730_s16, %s726_s15 }
   0xc   : > { %s806_s24 = scalar_select %p24_p1, %s734_s17, %s26_s22  }
   0xd   : > { %p808_p5 = por %p34_p2, %p33_p0  ;;  %p812_p6 = por %p126_p3, %p33_p0 }
   0xe   : > { %p132_p7 = scmp.eq.s32.totalorder %s511_s20, 1  ;;  %p512_p8 = scmp.ge.s32.totalorder %s738_s18, 1 }
   0xf   : > { %s1045_s25 = scalar_select %p808_p5, 1, 0 }
  0x10   : > { %s1046_s26 = scalar_select %p812_p6, 1, 0 }
  0x11   : > { %p139_p9 = scmp.lt.s32.totalorder %s738_s18, 3  ;;  %p818_p10 = por %p132_p7, %p131_p4 }
  0x12   : > { %p1041_p11 = scmp.eq.s32.totalorder %s790_s19, 0  ;;  %s163_s5 = sshll.u32 %s1038_s2, 4  ;;  %s164_s5 = int_to_ptr.vmem [resolvable:$true] %s163_s5 }
  0x13   : > { %s1047_s27 = scalar_select %p818_p10, 1, 0 }
  0x14   : > { %p823_p12 = pnand %p512_p8, %p139_p9  ;;  %s152_s8 = sshll.u32 %s1037_s1, 4  ;;  %s153_s8 = int_to_ptr.vmem [resolvable:$true] %s152_s8 }
  0x15   : > { %s174_s12 = sshll.u32 %s1039_s3, 4  ;;  %s623_s13 = scalar_lea.vmem %s164_s5, 16  ;;  %s844_s12 = int_to_ptr.vmem [resolvable:$true] %s174_s12 }
  0x16   : > { %s1048_s28 = scalar_select %p823_p12, 1, 0 }
  0x17   : > { %p567_p13 = pneg %p823_p12  ;;  %p624_p1 = scmp.ne.s32.totalorder %s164_s5, %s623_s13 }
  0x18   : > { %p631_p7 = scmp.lt.s32.totalorder %s164_s5, %s164_s5  ;;  %p632_p8 = scmp.lt.s32.totalorder %s623_s13, %s623_s13 }
  0x19   : > { %p837_p0 = pnand %p1041_p11, %p567_p13 }
  0x1a   : > { %p633_p9 = por %p632_p8, %p631_p7 }
  0x1b   : > { %p625_p2 = pneg %p837_p0 }
  0x1d   : > { %p626_p3 = pnand %p625_p2, %p624_p1 }
  0x1f   : > { %p627_p4 = pneg %p626_p3 }
  0x21   : > { %p634_p13 = pnand %p633_p9, %p627_p4 }
  0x23   : > { %637 = shalt.err (!%p634_p13)
}
  0x24   : > { %s740_s14 = smov [#allocation6]   ;;  %s638_s20 = scalar_lea.vmem %s153_s8, 16 }
  0x25   : > { %573 = dma.vmem_to_smem (!%p837_p0), %s164_s5, 16, %s740_s14, [#allocation7]  }
  0x26   : > { %p639_p11 = scmp.ne.s32.totalorder %s153_s8, %s638_s20  ;;  %p646_p12 = scmp.lt.s32.totalorder %s153_s8, %s153_s8 }
  0x27   : > { %p647_p5 = scmp.lt.s32.totalorder %s638_s20, %s638_s20 }
  0x28   : > { %p641_p10 = pnand %p639_p11, %p625_p2 }
  0x29   : > { %p648_p1 = por %p647_p5, %p646_p12 }
  0x2a   : > { %p642_p6 = pneg %p641_p10 }
  0x2c   : > { %p649_p3 = pnand %p648_p1, %p642_p6 }
  0x2e   : > { %652 = shalt.err (!%p649_p3)
}
  0x2f   : > { %s741_s22 = smov [#allocation3]   ;;  %s653_s23 = scalar_lea.vmem %s844_s12, 16 }
  0x30   : > { %570 = dma.vmem_to_smem (!%p837_p0), %s153_s8, 16, %s741_s22, [#allocation5]  }
  0x31   : > { %p654_p4 = scmp.ne.s32.totalorder %s844_s12, %s653_s23  ;;  %p661_p10 = scmp.lt.s32.totalorder %s844_s12, %s844_s12 }
  0x32   : > { %p662_p8 = scmp.lt.s32.totalorder %s653_s23, %s653_s23 }
  0x33   : > { %p656_p7 = pnand %p654_p4, %p625_p2 }
  0x34   : > { %p663_p5 = por %p662_p8, %p661_p10 }
  0x35   : > { %p657_p11 = pneg %p656_p7 }
  0x37   : > { %p664_p6 = pnand %p663_p5, %p657_p11 }
  0x39   : > { %667 = shalt.err (!%p664_p6)
}
  0x3a   : > { %s742_s29 = smov [#allocation8]   ;;  %p516_p12 = scmp.ge.s32.totalorder %s738_s18, 2 }
  0x3b   : > { %576 = dma.vmem_to_smem (!%p837_p0), %s844_s12, 16, %s742_s29, [#allocation7]  }
  0x3c   : > { %181 = sbr.rel (%p516_p12) target bundleno = 79 (0x4f), region = 28  ;;  %p1050_p9 = scmp.ne.s32.totalorder (!%p516_p12), %s1045_s25, 0 }
  0x43   : > { %184 = sbr.rel (!%p1050_p9) target bundleno = 79 (0x4f), region = 32  ;;  %s186_s30 = sand.u32 (%p1050_p9), 1, %s734_s17  }
  0x44   : > { %s518_s5 = sshll.u32 (%p1050_p9), %s738_s18, 3  ;;  %s517_s6 = sshll.u32 (%p1050_p9), %s186_s30, 5 }
  0x45   : > { %s1051_s0 = sld [smem:[#allocation13_spill]] (%p1050_p9)  ;;  %s188_s9 = scalar_lea.vmem (%p1050_p9), [#allocation2], %s517_s6 }
  0x4b   : > { %s190_s10 = scalar_lea.vmem %s1051_s0, %s518_s5 }
  0x4c   : > { %v224_v0 = vld [vmem:[%s190_s10] sm:$0xff]  ;;  %v226_v1 = vld [vmem:[%s190_s10 + $0x10] sm:$0xff] }
  0x4d   : > { %v228_v2 = vld [vmem:[%s190_s10 + $0x20] sm:$0xff]  ;;  %225 = vst [vmem:[%s188_s9] sm:$0xff] %v224_v0  ;;  %227 = vst [vmem:[%s188_s9 + $0x8] sm:$0xff] %v226_v1  ;;  %v230_v3 = vld [vmem:[%s190_s10 + $0x30] sm:$0xff] }
  0x4e   : > { %229 = vst [vmem:[%s188_s9 + $0x10] sm:$0xff] %v228_v2  ;;  %231 = vst [vmem:[%s188_s9 + $0x18] sm:$0xff] %v230_v3 }
  0x4f PF: > { %p1052_p0 = scmp.ne.s32.totalorder %s1048_s28, 0 }
  0x50   : > { %s881_s25 = sand.u32 (!%p1052_p0), 1, %s730_s16   ;;  %p1053_p2 = scmp.eq.s32.totalorder (!%p1052_p0), %s790_s19, 0 }
  0x51   : > { %240 = sbr.rel (%p1052_p0) target bundleno = 145 (0x91), region = 70  ;;  %s520_s11 = sshll.u32 (!%p1052_p0), %s881_s25, 5 }
  0x52   : > { %s245_s12 = scalar_lea.vmem (!%p1052_p0), [#allocation2], %s520_s11 }
  0x58   : > { %713 = dma.done.wait (%p1053_p2), [#allocation5], 16   ;;  %p1054_p13 = pmov %p1053_p2 }
  0x59   : > { %p1055_p1 = pmov %p1053_p2 }
  0x5a   : > { %715 = vsyncadd (%p1054_p13), [#allocation5], 4294967280 }
  0x5b   : > { %717 = dma.done.wait (%p1055_p1), [#allocation7], 32   ;;  %p1056_p3 = pmov %p1055_p1 }
  0x5d   : > { %719 = vsyncadd (%p1056_p3), [#allocation7], 4294967264 }
  0x5e   : > { %261 = sfence }
  0x5f   : > { %s281_s28 = sld [smem:[#allocation3]]  ;;  %v892_v4 = vld [vmem:[%s245_s12] sm:$0xff]  ;;  %s525_s13 = sld [smem:[#allocation3 + $0x1]]  ;;  %v894_v5 = vld [vmem:[%s245_s12 + $0x8] sm:$0xff]  ;;  %v898_v6 = vld [vmem:[%s245_s12 + $0x10] sm:$0xff] }
  0x60   : > { %s526_s14 = sld [smem:[#allocation3 + $0x2]]  ;;  %s896_s20 = sld [smem:[#allocation3 + $0x3]]  ;;  %v904_v7 = vld [vmem:[%s245_s12 + $0x18] sm:$0xff]  ;;  %v315_v8 = vmul.f32 %v892_v4, %v892_v4  ;;  %v320_v9 = vmul.f32 %v894_v5, %v892_v4  ;;  %v327_v10 = vmul.f32 %v898_v6, %v892_v4  ;;  %v341_v15 = vmul.f32 %v894_v5, %v894_v5 }
  0x61   : > { %s900_s22 = sld [smem:[#allocation3 + $0x4]]  ;;  %s902_s23 = sld [smem:[#allocation3 + $0x5]]  ;;  %v334_v12 = vmul.f32 %v904_v7, %v892_v4  ;;  %v348_v16 = vmul.f32 %v898_v6, %v894_v5  ;;  %v355_v27 = vmul.f32 %v904_v7, %v894_v5  ;;  %v362_v28 = vmul.f32 %v898_v6, %v898_v6 }
  0x62   : > { %s908_s29 = sld [smem:[#allocation3 + $0x6]]  ;;  %s912_s30 = sld [smem:[#allocation3 + $0x7]]  ;;  %v369_v44 = vmul.f32 %v904_v7, %v898_v6  ;;  %v376_v48 = vmul.f32 %v904_v7, %v904_v7 }
  0x63   : > { %s914_s5 = sld [smem:[#allocation3 + $0x8]]  ;;  %s920_s7 = sld [smem:[#allocation6 + $0x1]] }
  0x64   : > { %s918_s6 = sld [smem:[#allocation6]]  ;;  %s924_s8 = sld [smem:[#allocation6 + $0x2]] }
  0x65   : > { %v316_v11 = vstv %s281_s28  ;;  %s926_s10 = sld [smem:[#allocation6 + $0x3]]  ;;  %v321_v14 = vstv %s525_s13  ;;  %s932_s9 = sld [smem:[#allocation6 + $0x4]] }
  0x66   : > { %v317_v13 = vmul.f32 %v316_v11, %v315_v8  ;;  %s934_s11 = sld [smem:[#allocation6 + $0x5]]  ;;  %v322_v17 = vmul.f32 %v321_v14, %v320_v9  ;;  %v328_v18 = vstv %s526_s14  ;;  %v335_v19 = vstv %s896_s20  ;;  %s937_s12 = sld [smem:[#allocation3 + $0x9]] }
  0x67   : > { %v329_v20 = vmul.f32 %v328_v18, %v327_v10  ;;  %v342_v21 = vstv %s900_s22  ;;  %v349_v22 = vstv %s902_s23  ;;  %s941_s28 = sld [smem:[#allocation6 + $0x6]]  ;;  %s943_s13 = sld [smem:[#allocation6 + $0x7]]  ;;  %v336_v24 = vmul.f32 %v335_v19, %v334_v12 }
  0x68   : > { %v323_v23 = vadd.f32 %v322_v17, %v317_v13  ;;  %s945_s0 = sld [smem:[#allocation8]]  ;;  %s947_s14 = sld [smem:[#allocation8 + $0x1]]  ;;  %v343_v25 = vmul.f32 %v342_v21, %v341_v15  ;;  %v350_v26 = vmul.f32 %v349_v22, %v348_v16  ;;  %v356_v32 = vstv %s908_s29 }
  0x69   : > { %s953_s20 = sld [smem:[#allocation8 + $0x2]]  ;;  %v324_v30 = vstv %s920_s7  ;;  %s960_s22 = sld [smem:[#allocation6 + $0x8]]  ;;  %v363_v40 = vstv %s912_s30  ;;  %v357_v46 = vmul.f32 %v356_v32, %v355_v27  ;;  %v370_v47 = vstv %s914_s5 }
  0x6a   : > { %v318_v29 = vstv %s918_s6  ;;  %v330_v31 = vadd.f32 %v329_v20, %v323_v23  ;;  %v325_v34 = vmul.f32 %v324_v30, %v320_v9  ;;  %v331_v35 = vstv %s924_s8  ;;  %s967_s23 = sld [smem:[#allocation6 + $0x9]]  ;;  %s969_s29 = sld [smem:[#allocation8 + $0x3]] }
  0x6b   : > { %v319_v33 = vmul.f32 %v318_v29, %v315_v8  ;;  %v338_v36 = vstv %s926_s10  ;;  %v332_v37 = vmul.f32 %v331_v35, %v327_v10  ;;  %v345_v39 = vstv %s932_s9  ;;  %s550_s6 = sshll.u32 %s790_s19, 7  ;;  %s399_s9 = scalar_lea.sflag [#allocation4], %s881_s25 }
  0x6c   : > { %v337_v38 = vadd.f32 %v336_v24, %v330_v31  ;;  %v339_v42 = vmul.f32 %v338_v36, %v334_v12  ;;  %v352_v43 = vstv %s934_s11  ;;  %v346_v50 = vmul.f32 %v345_v39, %v341_v15  ;;  %s994_s10 = scalar_lea.hbm %s1040_s4, %s550_s6  ;;  %p1057_p7 = scmp.ne.s32.totalorder %s1046_s26, 0 }
  0x6d   : > { %v326_v41 = vadd.f32 %v325_v34, %v319_v33  ;;  %v364_v51 = vmul.f32 %v363_v40, %v362_v28  ;;  %v377_v52 = vstv %s937_s12  ;;  %v353_v54 = vmul.f32 %v352_v43, %v348_v16  ;;  %s743_s19 = smov [#allocation9]  }
  0x6e   : > { %v344_v45 = vadd.f32 %v343_v25, %v337_v38  ;;  %v359_v55 = vstv %s941_s28  ;;  %v366_v56 = vstv %s943_s13  ;;  %v371_v58 = vmul.f32 %v370_v47, %v369_v44  ;;  %s672_s12 = sshll.u32 %s743_s19, 4  ;;  %s673_s12 = int_to_ptr.vmem [resolvable:$false] %s672_s12 }
  0x6f   : > { %v333_v49 = vadd.f32 %v332_v37, %v326_v41  ;;  %v383_v59 = vstv %s945_s0  ;;  %v385_v60 = vstv %s947_s14  ;;  %v388_v0 = vstv %s953_s20  ;;  %s524_s0 = sshll.u32 %s881_s25, 3  ;;  %s674_s28 = scalar_lea.vmem %s673_s12, 256 }
  0x70   : > { %v351_v53 = vadd.f32 %v350_v26, %v344_v45  ;;  %v384_v62 = vmul.f32 %v383_v59, %v892_v4  ;;  %v386_v63 = vmul.f32 %v894_v5, %v385_v60  ;;  %v360_v2 = vmul.f32 %v359_v55, %v355_v27  ;;  %s280_s30 = scalar_lea.vmem [#allocation9], %s524_s0 }
  0x71   : > { %v340_v57 = vadd.f32 %v339_v42, %v333_v49  ;;  %v373_v8 = vstv %s960_s22  ;;  %v378_v9 = vmul.f32 %v377_v52, %v376_v48  ;;  %v367_v11 = vmul.f32 %v366_v56, %v362_v28  ;;  %s412_s5 = sshll.u32 %s280_s30, 4  ;;  %s989_s5 = int_to_ptr.vmem [resolvable:$true] %s412_s5 }
  0x72   : > { %v358_v61 = vadd.f32 %v357_v46, %v351_v53  ;;  %v387_v12 = vadd.f32 %v386_v63, %v384_v62  ;;  %v389_v13 = vmul.f32 %v898_v6, %v388_v0  ;;  %v380_v15 = vstv %s967_s23  ;;  %s668_s11 = scalar_lea.vmem %s989_s5, 128  ;;  %p675_p8 = scmp.lt.s32.totalorder %s989_s5, %s673_s12 }
  0x73   : > { %v347_v1 = vadd.f32 %v346_v50, %v340_v57  ;;  %v391_v16 = vstv %s969_s29  ;;  %v374_v4 = vmul.f32 %v373_v8, %v369_v44  ;;  %v381_v19 = vmul.f32 %v380_v15, %v376_v48  ;;  %p669_p4 = scmp.ne.s32.totalorder %s989_s5, %s668_s11  ;;  %p676_p5 = scmp.lt.s32.totalorder %s674_s28, %s668_s11 }
  0x74   : > { %v365_v3 = vadd.f32 %v364_v51, %v358_v61  ;;  %v390_v20 = vadd.f32 %v389_v13, %v387_v12  ;;  %v392_v21 = vmul.f32 %v904_v7, %v391_v16 }
  0x75   : > { %v354_v10 = vadd.f32 %v353_v54, %v347_v1  ;;  %p670_p11 = pnand %p669_p4, %p1057_p7  ;;  %p677_p6 = por %p676_p5, %p675_p8 }
  0x76   : > { %v372_v14 = vadd.f32 %v371_v58, %v365_v3  ;;  %v393_v25 = vadd.f32 %v392_v21, %v390_v20 }
  0x77   : > { %v361_v17 = vadd.f32 %v360_v2, %v354_v10  ;;  %p671_p10 = pneg %p670_p11 }
  0x78   : > { %v379_v5 = vadd.f32 %v378_v9, %v372_v14 }
  0x79   : > { %v368_v18 = vadd.f32 %v367_v11, %v361_v17  ;;  %p678_p9 = pnand %p677_p6, %p671_p10 }
  0x7a   : > { %v394_v23 = vmul.f32 %v379_v5, %v379_v5 }
  0x7b   : > { %v375_v22 = vadd.f32 %v374_v4, %v368_v18 }
  0x7d   : > { %v382_v24 = vadd.f32 %v381_v19, %v375_v22 }
  0x7f   : > { %v395_v6 = vadd.f32 %v394_v23, %v382_v24 }
  0x81   : > { %v396_v26 = vadd.f32 %v395_v6, %v393_v25 }
  0x83   : > { %397 = vst [vmem:[%s280_s30] sm:$0xff] %v396_v26 }
  0x84   : > { %681 = shalt.err (!%p678_p9)
}
  0x85   : > { %s682_s25 = scalar_lea.hbm %s994_s10, 128  ;;  %s686_s20 = scalar_lea.hbm %s1040_s4, 256 }
  0x86   : > { %p683_p0 = scmp.ne.s32.totalorder %s994_s10, %s682_s25  ;;  %p687_p1 = scmp.lt.u32.totalorder %s994_s10, %s1040_s4 }
  0x87   : > { %p688_p3 = scmp.lt.u32.totalorder %s686_s20, %s682_s25  ;;  %p690_p11 = scmp.lt.u32.totalorder %s682_s25, %s994_s10 }
  0x88   : > { %p684_p2 = pnand %p683_p0, %p1057_p7 }
  0x89   : > { %p689_p4 = por %p688_p3, %p687_p1 }
  0x8a   : > { %p685_p13 = pneg %p684_p2 }
  0x8b   : > { %p691_p10 = por %p690_p11, %p689_p4 }
  0x8d   : > { %p692_p8 = pnand %p691_p10, %p685_p13 }
  0x8f   : > { %695 = shalt.err (!%p692_p8)
}
  0x90   : > { %565 = dma.vmem_to_hbm [thread:$0]  (%p1057_p7), %s989_s5, 128, %s994_s10, %s399_s9  }
  0x91 PF: > { %s424_s29 = sand.u32 1, %s726_s15   ;;  %p1058_p5 = scmp.ne.s32.totalorder %s1047_s27, 0 }
  0x92   : > { %s425_s0 = scalar_lea.sflag [#allocation4], %s424_s29 }
  0x93   : > { %p578_p6 = pnand %p516_p12, %p1058_p5 }
  0x95   : > { %721 = dma.done.wait (!%p578_p6), %s425_s0, 128  }
  0x96   : > { %723 = vsyncadd (!%p578_p6), %s425_s0, 4294967168  ;;  %p16_p9 = scmp.ge.s32.totalorder %s794_s21, 4   ;;  %s1059_s15 = smov %s730_s16 }
  0x97   : > { %s1060_s16 = smov %s734_s17  ;;  %s1061_s17 = smov %s806_s24 }
  0x98   : > { %s1062_s18 = smov %s794_s21  ;;  %18 = sbr.rel (!%p16_p9) target bundleno = 7 (0x7), region = 130 }
  0x9f   :  { %430 = vsyncpa [#allocation4], 1 }
  0xa0   :  { %432 = vsyncpa [#allocation4 + $0x1], 1 }
  0xa1   :  { %433 = vsyncpa [#allocation5], 1 }
  0xa2   :  { %435 = vsyncpa [#allocation5 + $0x1], 1 }
  0xa3   :  { %436 = vsyncpa [#allocation7], 1 }

</bundles_post_ra>
